<compile_context>
chip_gen: v5e
topology: v5e:2x2
jax: 0.10.0
libtpu: 0.0.40
codegen_flags: <defaults>
</compile_context>

<pallas_src>
import math

import numpy as np
import jax
import jax.numpy as jnp
from jax import lax
from jax.experimental import pallas as pl
from jax.experimental.pallas import tpu as pltpu

# Model hyperparameters (small, consistent with the module's __init__).
N_EMBD = 32
NUM_HEAD = 4
HEAD_DIM = N_EMBD // NUM_HEAD
N_CTX = 8
BATCH = 2
SEQ = 8                      # num_token <= n_ctx
ROWS = BATCH * SEQ           # flattened batch*time rows = 16

# ---- packed parameter slab layout (one DMA; all row offsets 8-aligned) ----
ROW_WATTN = 0                          # (E, 3E)   c_attn weight
ROW_BATTN = N_EMBD                     # (1, 3E)   c_attn bias
ROW_WPROJ = 40                         # (E, E)    c_proj weight
ROW_BPROJ = ROW_WPROJ + N_EMBD         # (1, E)    c_proj bias
ROW_MASK = 80                          # (H*R, E)  head-column mask | (H*R, R) additive bias
PACK_ROWS = ROW_MASK + NUM_HEAD * ROWS  # 144
PACK_COLS = 3 * N_EMBD                  # 96

# ---- trace-time constants (numpy), baked into the packed slab ----
_r = np.arange(ROWS)
_allowed = ((_r[:, None] // SEQ) == (_r[None, :] // SEQ)) & \
           ((_r[:, None] % SEQ) >= (_r[None, :] % SEQ))
# Additive bias tiled over heads (row block h == head h): 0 where attention is allowed
# (same batch element AND causal), -1e30 elsewhere (exp underflows to exactly 0, so the
# block-diagonal result equals independent per-batch causal attention).  Every row has
# its diagonal unmasked, so no fully-masked rows exist.
_BIAS_NP = np.tile(np.where(_allowed, 0.0, -1e30).astype(np.float32), (NUM_HEAD, 1))
# Head-column mask: row block h keeps only embedding columns belonging to head h.
_HEAD_MASK_NP = (
    (np.arange(N_EMBD)[None, :] // HEAD_DIM)
    == np.repeat(np.arange(NUM_HEAD), ROWS)[:, None]
).astype(np.float32)                                        # (H*R, E) = (64, 32)


def _mha_kernel(x_ref, p_ref, o_ref):
    """Single grid step: whole flattened batch (B*T rows) resident in VMEM."""
    R, E = ROWS, N_EMBD
    H, D = NUM_HEAD, HEAD_DIM
    scale = 1.0 / math.sqrt(D)

    # ---- static slices of the packed parameter slab (one DMA'd VMEM block) ----
    w_attn = p_ref[ROW_WATTN:ROW_WATTN + E, :]                 # (32, 96)
    b_attn = p_ref[ROW_BATTN:ROW_BATTN + 1, :]                 # (1, 96)
    w_proj = p_ref[ROW_WPROJ:ROW_WPROJ + E, 0:E]               # (32, 32)
    b_proj = p_ref[ROW_BPROJ:ROW_BPROJ + 1, 0:E]               # (1, 32)
    head_mask = p_ref[ROW_MASK:ROW_MASK + H * R, 0:E]          # (64, 32)
    bias = p_ref[ROW_MASK:ROW_MASK + H * R, E:E + R]           # (64, 16)

    # ---- c_attn: qkv projection over ALL B*T rows, one MXU matmul ----
    x = x_ref[...]                                             # (16, 32)
    qkv = jnp.dot(x, w_attn, preferred_element_type=jnp.float32) + b_attn  # (16, 96)
    q = qkv[:, 0:E]
    k = qkv[:, E:2 * E]
    v = qkv[:, 2 * E:3 * E]

    # ---- scores for ALL heads in one matmul ----
    # Stack q per head along rows (row block h = head h), zero the other heads'
    # embedding columns, then contract the embedding axis of both operands
    # (no explicit k transpose is materialized).
    bd_q = jnp.concatenate([q] * H, axis=0) * head_mask        # (64, 32)
    s = lax.dot_general(bd_q, k, (((1,), (1,)), ((), ())),
                        preferred_element_type=jnp.float32)    # (64, 16)
    s = s * scale + bias

    # ---- exact per-row (= per-head, per-query) softmax ----
    s = s - jnp.max(s, axis=-1, keepdims=True)
    p = jnp.exp(s)
    p = p / jnp.sum(p, axis=-1, keepdims=True)

    # ---- context for ALL heads in one matmul; re-interleave heads in-register ----
    # ctx_full[h*R+i, :] = P_h[i, :] @ v ; the head-column mask keeps only head h's
    # columns in row block h, and summing the H row blocks interleaves the heads
    # back into (R, E).  Nothing goes through VMEM scratch.
    ctx_full = jnp.dot(p, v, preferred_element_type=jnp.float32) * head_mask  # (64, 32)
    ctx = (ctx_full[0 * R:1 * R, :] + ctx_full[1 * R:2 * R, :]
           + ctx_full[2 * R:3 * R, :] + ctx_full[3 * R:4 * R, :])              # (16, 32)

    # ---- c_proj over all B*T rows, one MXU matmul ----
    out = jnp.dot(ctx, w_proj, preferred_element_type=jnp.float32) + b_proj
    o_ref[...] = out.astype(o_ref.dtype)


def _pack_params(w_attn, b_attn, w_proj, b_proj):
    """Pack weights + precomputed masks into one (PACK_ROWS, PACK_COLS) f32 slab."""
    E = N_EMBD
    p = jnp.zeros((PACK_ROWS, PACK_COLS), jnp.float32)
    p = p.at[ROW_WATTN:ROW_WATTN + E, :].set(w_attn.astype(jnp.float32))
    p = p.at[ROW_BATTN, :].set(b_attn.astype(jnp.float32))
    p = p.at[ROW_WPROJ:ROW_WPROJ + E, 0:E].set(w_proj.astype(jnp.float32))
    p = p.at[ROW_BPROJ, 0:E].set(b_proj.astype(jnp.float32))
    p = p.at[ROW_MASK:ROW_MASK + NUM_HEAD * ROWS, 0:E].set(_HEAD_MASK_NP)
    p = p.at[ROW_MASK:ROW_MASK + NUM_HEAD * ROWS, E:E + ROWS].set(_BIAS_NP)
    return p


@jax.jit
def mha_forward(x, w_attn, b_attn, w_proj, b_proj):
    """x: (B, T, E); w_attn: (E, 3E); b_attn: (3E,); w_proj: (E, E); b_proj: (E,)."""
    B, T, E = x.shape
    x2 = x.reshape(B * T, E)                      # flatten batch: one kernel invocation
    params = _pack_params(w_attn, b_attn, w_proj, b_proj)

    out2 = pl.pallas_call(
        _mha_kernel,
        out_shape=jax.ShapeDtypeStruct((B * T, E), x.dtype),
        grid_spec=pltpu.PrefetchScalarGridSpec(
            num_scalar_prefetch=0,
            grid=(1,),                                              # single step
            in_specs=[
                pl.BlockSpec((B * T, E), lambda i: (0, 0)),         # x, flattened (16, 32)
                pl.BlockSpec((PACK_ROWS, PACK_COLS), lambda i: (0, 0)),  # packed params
            ],
            out_specs=pl.BlockSpec((B * T, E), lambda i: (0, 0)),
        ),
        compiler_params=pltpu.CompilerParams(
            dimension_semantics=("arbitrary",)),
    )(x2, params)

    return out2.reshape(B, T, E)                  # free metadata reshape in the wrapper


def _reference(x, w_attn, b_attn, w_proj, b_proj):
    """Pure-JAX reference mirroring the PyTorch forward (eval mode)."""
    B, T, E = x.shape
    qkv = x @ w_attn + b_attn                       # (B, T, 3E)
    q, k, v = jnp.split(qkv, 3, axis=-1)

    def heads(t):
        return t.reshape(B, T, NUM_HEAD, HEAD_DIM).transpose(0, 2, 1, 3)

    q, k, v = heads(q), heads(k), heads(v)          # (B, H, T, D)
    s = jnp.einsum("bhqd,bhkd->bhqk", q, k) * (1.0 / math.sqrt(HEAD_DIM))
    mask = jnp.tril(jnp.ones((T, T), dtype=bool))
    s = jnp.where(mask[None, None], s, -jnp.inf)
    p = jax.nn.softmax(s, axis=-1)
    ctx = jnp.einsum("bhqk,bhkd->bhqd", p, v)       # (B, H, T, D)
    ctx = ctx.transpose(0, 2, 1, 3).reshape(B, T, E)
    return ctx @ w_proj + b_proj


if __name__ == "__main__":
    key = jax.random.PRNGKey(0)
    kx, kwa, kba, kwp, kbp = jax.random.split(key, 5)

    x = jax.random.normal(kx, (BATCH, SEQ, N_EMBD), dtype=jnp.float32)

    # Deterministic parameter init (uniform ~ nn.Linear default range).
    bound_attn = 1.0 / math.sqrt(N_EMBD)
    w_attn = jax.random.uniform(kwa, (N_EMBD, 3 * N_EMBD), jnp.float32,
                                -bound_attn, bound_attn)   # (in, out)
    b_attn = jax.random.uniform(kba, (3 * N_EMBD,), jnp.float32,
                                -bound_attn, bound_attn)
    w_proj = jax.random.uniform(kwp, (N_EMBD, N_EMBD), jnp.float32,
                                -bound_attn, bound_attn)   # (in, out)
    b_proj = jax.random.uniform(kbp, (N_EMBD,), jnp.float32,
                                -bound_attn, bound_attn)

    out = mha_forward(x, w_attn, b_attn, w_proj, b_proj)
    out = jax.block_until_ready(out)

    ref = _reference(x, w_attn, b_attn, w_proj, b_proj)
    assert out.shape == (BATCH, SEQ, N_EMBD)
    # Exact softmax normalization (no approx reciprocal) -> tight tolerance.
    assert jnp.allclose(out, ref, atol=1e-4, rtol=1e-4), "mismatch vs reference"

    print("KERNEL_OK")
</pallas_src>

<mosaic_0001>
module attributes {stable_mosaic.version = 11 : i64} {
  func.func @_mha_kernel(%arg0: i32, %arg1: memref<16x32xf32, #tpu.memory_space<vmem>>, %arg2: memref<144x96xf32, #tpu.memory_space<vmem>>, %arg3: memref<16x32xf32, #tpu.memory_space<vmem>>) attributes {dimension_semantics = [#tpu.dimension_semantics<arbitrary>], iteration_bounds = array<i64: 1>, scalar_prefetch = 0 : i64, scratch_operands = 0 : i64, tpu.core_type = #tpu.core_type<tc>, window_params = [{pipeline_mode = #tpu.pipeline_mode<synchronous>, transform_indices = @transform_0, window_bounds = array<i64: 16, 32>}, {pipeline_mode = #tpu.pipeline_mode<synchronous>, transform_indices = @transform_1, window_bounds = array<i64: 144, 96>}, {pipeline_mode = #tpu.pipeline_mode<synchronous>, transform_indices = @transform_2, window_bounds = array<i64: 16, 32>}]} {
    %c0 = arith.constant 0 : index
    %c0_0 = arith.constant 0 : index
    %0 = vector.load %arg2[%c0, %c0_0] : memref<144x96xf32, #tpu.memory_space<vmem>>, vector<32x96xf32>
    %c32 = arith.constant 32 : index
    %c0_1 = arith.constant 0 : index
    %1 = vector.load %arg2[%c32, %c0_1] : memref<144x96xf32, #tpu.memory_space<vmem>>, vector<1x96xf32>
    %c40 = arith.constant 40 : index
    %c0_2 = arith.constant 0 : index
    %2 = vector.load %arg2[%c40, %c0_2] : memref<144x96xf32, #tpu.memory_space<vmem>>, vector<32x32xf32>
    %c72 = arith.constant 72 : index
    %c0_3 = arith.constant 0 : index
    %3 = vector.load %arg2[%c72, %c0_3] : memref<144x96xf32, #tpu.memory_space<vmem>>, vector<1x32xf32>
    %c80 = arith.constant 80 : index
    %c0_4 = arith.constant 0 : index
    %4 = vector.load %arg2[%c80, %c0_4] : memref<144x96xf32, #tpu.memory_space<vmem>>, vector<64x32xf32>
    %c80_5 = arith.constant 80 : index
    %c32_6 = arith.constant 32 : index
    %5 = vector.load %arg2[%c80_5, %c32_6] : memref<144x96xf32, #tpu.memory_space<vmem>>, vector<64x16xf32>
    %c0_7 = arith.constant 0 : index
    %c0_8 = arith.constant 0 : index
    %6 = vector.load %arg1[%c0_7, %c0_8] : memref<16x32xf32, #tpu.memory_space<vmem>>, vector<16x32xf32>
    %cst = arith.constant dense<0.000000e+00> : vector<16x96xf32>
    %7 = tpu.matmul %6, %0, %cst {dimension_numbers = #tpu.dot_dimension_numbers<[1], [0], [0], [1], [0, 0, 1, 1], [], []>} : vector<16x32xf32>, vector<32x96xf32>, vector<16x96xf32> -> vector<16x96xf32>
    %8 = vector.broadcast %1 : vector<1x96xf32> to vector<16x96xf32>
    %9 = arith.addf %7, %8 : vector<16x96xf32>
    %10 = vector.extract_strided_slice %9 {offsets = [0, 0], sizes = [16, 32], strides = [1, 1]} : vector<16x96xf32> to vector<16x32xf32>
    %11 = vector.extract_strided_slice %9 {offsets = [0, 32], sizes = [16, 32], strides = [1, 1]} : vector<16x96xf32> to vector<16x32xf32>
    %12 = vector.extract_strided_slice %9 {offsets = [0, 64], sizes = [16, 32], strides = [1, 1]} : vector<16x96xf32> to vector<16x32xf32>
    %13 = tpu.concatenate %10, %10, %10, %10 in 0 : vector<16x32xf32>, vector<16x32xf32>, vector<16x32xf32>, vector<16x32xf32> -> vector<64x32xf32>
    %14 = arith.mulf %13, %4 : vector<64x32xf32>
    %cst_9 = arith.constant dense<0.000000e+00> : vector<64x16xf32>
    %15 = tpu.matmul %14, %11, %cst_9 {dimension_numbers = #tpu.dot_dimension_numbers<[1], [1], [0], [0], [0, 0, 1, 0], [], []>} : vector<64x32xf32>, vector<16x32xf32>, vector<64x16xf32> -> vector<64x16xf32>
    %cst_10 = arith.constant 0.353553385 : f32
    %16 = vector.broadcast %cst_10 : f32 to vector<64x16xf32>
    %17 = arith.mulf %15, %16 : vector<64x16xf32>
    %18 = arith.addf %17, %5 : vector<64x16xf32>
    %cst_11 = arith.constant dense<0xFF800000> : vector<64xf32>
    %19 = vector.multi_reduction <maximumf>, %18, %cst_11 [1] : vector<64x16xf32> to vector<64xf32>
    %20 = vector.shape_cast %19 : vector<64xf32> to vector<64x1xf32>
    %21 = vector.broadcast %20 : vector<64x1xf32> to vector<64x16xf32>
    %22 = arith.subf %18, %21 : vector<64x16xf32>
    %23 = math.exp %22 : vector<64x16xf32>
    %cst_12 = arith.constant dense<0.000000e+00> : vector<64xf32>
    %24 = vector.multi_reduction <add>, %23, %cst_12 [1] : vector<64x16xf32> to vector<64xf32>
    %25 = vector.shape_cast %24 : vector<64xf32> to vector<64x1xf32>
    %26 = vector.broadcast %25 : vector<64x1xf32> to vector<64x16xf32>
    %27 = arith.divf %23, %26 : vector<64x16xf32>
    %cst_13 = arith.constant dense<0.000000e+00> : vector<64x32xf32>
    %28 = tpu.matmul %27, %12, %cst_13 {dimension_numbers = #tpu.dot_dimension_numbers<[1], [0], [0], [1], [0, 0, 1, 1], [], []>} : vector<64x16xf32>, vector<16x32xf32>, vector<64x32xf32> -> vector<64x32xf32>
    %29 = arith.mulf %28, %4 : vector<64x32xf32>
    %30 = vector.extract_strided_slice %29 {offsets = [0, 0], sizes = [16, 32], strides = [1, 1]} : vector<64x32xf32> to vector<16x32xf32>
    %31 = vector.extract_strided_slice %29 {offsets = [16, 0], sizes = [16, 32], strides = [1, 1]} : vector<64x32xf32> to vector<16x32xf32>
    %32 = arith.addf %30, %31 : vector<16x32xf32>
    %33 = vector.extract_strided_slice %29 {offsets = [32, 0], sizes = [16, 32], strides = [1, 1]} : vector<64x32xf32> to vector<16x32xf32>
    %34 = arith.addf %32, %33 : vector<16x32xf32>
    %35 = vector.extract_strided_slice %29 {offsets = [48, 0], sizes = [16, 32], strides = [1, 1]} : vector<64x32xf32> to vector<16x32xf32>
    %36 = arith.addf %34, %35 : vector<16x32xf32>
    %cst_14 = arith.constant dense<0.000000e+00> : vector<16x32xf32>
    %37 = tpu.matmul %36, %2, %cst_14 {dimension_numbers = #tpu.dot_dimension_numbers<[1], [0], [0], [1], [0, 0, 1, 1], [], []>} : vector<16x32xf32>, vector<32x32xf32>, vector<16x32xf32> -> vector<16x32xf32>
    %38 = vector.broadcast %3 : vector<1x32xf32> to vector<16x32xf32>
    %39 = arith.addf %37, %38 : vector<16x32xf32>
    %c0_15 = arith.constant 0 : index
    %c0_16 = arith.constant 0 : index
    %40 = vector.load %arg3[%c0_15, %c0_16] : memref<16x32xf32, #tpu.memory_space<vmem>>, vector<16x32xf32>
    tpu.vector_store %arg3[%c0_15, %c0_16], %39 {strides = array<i32>} : memref<16x32xf32, #tpu.memory_space<vmem>>, vector<16x32xf32>,
    return
  }
  func.func @transform_0(%arg0: i32) -> (i32, i32) {
    %c0_i32 = arith.constant 0 : i32
    %c0_i32_0 = arith.constant 0 : i32
    %c0_i32_1 = arith.constant 0 : i32
    return %c0_i32, %c0_i32_0 : i32, i32
  }
  func.func @transform_1(%arg0: i32) -> (i32, i32) {
    %c0_i32 = arith.constant 0 : i32
    %c0_i32_0 = arith.constant 0 : i32
    %c0_i32_1 = arith.constant 0 : i32
    return %c0_i32, %c0_i32_0 : i32, i32
  }
  func.func @transform_2(%arg0: i32) -> (i32, i32) {
    %c0_i32 = arith.constant 0 : i32
    %c0_i32_0 = arith.constant 0 : i32
    %c0_i32_1 = arith.constant 0 : i32
    return %c0_i32, %c0_i32_0 : i32, i32
  }
}

</mosaic_0001>

<bundles_post_ra>
// kernel: mha_forward.1
= control target key start
LH: loop header
LB: loop body
LE: loop exit
PB: predicated region body
PF: predicated region fallthrough
CT: control target
= control target key end

     0   :  { %s875_s0 = inlined_call_operand.vmem [shape: f32[16,32], index: 0, kind: input, shape index: {}]   ;;  %s876_s1 = inlined_call_operand.vmem [shape: f32[144,96], index: 1, kind: input, shape index: {}]   ;;  %s877_s2 = inlined_call_operand.hbm [shape: f32[16,32], index: 2, kind: output, shape index: {}]  }
   0x1   :  { %v15_v0 = vld [vmem:[%s876_s1 + $0x18] sm:$0xff]  ;;  %v14_v1 = vld [vmem:[%s876_s1 + $0x10] sm:$0xff]  ;;  %v13_v2 = vld [vmem:[%s876_s1 + $0x8] sm:$0xff] }
   0x2   :  { %52 = vmatpush.msra.mxu0 %v15_v0 }
   0x4   :  { %53 = vmatpush.msra.mxu0 %v14_v1 }
   0x5   :  { %7 = vsyncpa [#allocation3], 0  ;;  %v12_v3 = vld [vmem:[%s876_s1] sm:$0xff]  ;;  %vm33_vm0 = vcmask 261120   ;;  %v31_v5 = vld [vmem:[%s875_s0 + $0x8] sm:$0xff]  ;;  %s618_s25 = smov 96  }
   0x6   :  { %54 = vmatpush.msra.mxu0 %v13_v2  ;;  %v30_v4 = vld [vmem:[%s875_s0] sm:$0xff]  ;;  %v661_v6 = vld [vmem:[%s876_s1 + $0x50] sm:$0xff]  ;;  %v673_v8 = vld [vmem:[%s876_s1 + $0x68] sm:$0xff]  ;;  %vm194_vm1 = vcmask 130048   ;;  %s619_s11 = smov 64   ;;  %s620_s22 = smov [#allocation2]  }
   0x7   :  { %v666_v7 = vld [vmem:[%s876_s1 + $0x60] sm:$0xff]  ;;  %162 = vrot.lane.b32.xlu1 %v661_v6, %s618_s25  ;;  %v678_v9 = vld [vmem:[%s876_s1 + $0x58] sm:$0xff]  ;;  %v708_v18 = vld [vmem:[%s876_s1 + $0x70] sm:$0xff]  ;;  %s508_s23 = sshll.u32 %s620_s22, 4  ;;  %s510_s26 = sshll.u32 %s877_s2, 4  ;;  %s509_s23 = int_to_ptr.vmem [resolvable:$true] %s508_s23  ;;  %s511_s26 = int_to_ptr.hbm [resolvable:$true] %s510_s26 }
   0x8   :  { %55 = vmatpush.msra.mxu0 %v12_v3  ;;  %166 = vrot.lane.b32.xlu2 %v666_v7, %s618_s25  ;;  %v685_v10 = vld [vmem:[%s876_s1 + $0x78] sm:$0xff]  ;;  %v690_v11 = vld [vmem:[%s876_s1 + $0x80] sm:$0xff]  ;;  %v714_v19 = vld [vmem:[%s876_s1 + $0x88] sm:$0xff]  ;;  %s621_s27 = smov 128   ;;  %s622_s0 = smov 8  }
   0x9   :  { %522 = vmatmul.msk.f32.vlgmr.msra.gmra.mxu0 %vm33_vm0, %v30_v4  ;;  %v558_v13 = vld [vmem:[%s876_s1 + $0x20] ss:$0 sm:$0xff] }
   0xf   :  { %164 = vrot.lane.b32.xlu1 %v678_v9, %s618_s25 }
  0x10   :  { %168 = vrot.lane.b32.xlu2 %v673_v8, %s618_s25 }
  0x11   :  { %523 = vmatmul.msk.f32.gmra.mxu0 %vm33_vm0, %v31_v5 }
  0x17   :  { %174 = vrot.lane.b32.xlu1 %v690_v11, %s618_s25 }
  0x18   :  { %172 = vrot.lane.b32.xlu2 %v685_v10, %s618_s25 }
  0x62   :  { %v167_v35 = vpop.permute.xlu2 %166 }
  0x6a   :  { %v169_v48 = vpop.permute.xlu2 %168 }
  0x72   :  { %v173_v57 = vpop.permute.xlu2 %172 }
  0x79   :  { %v163_v30 = vpop.permute.xlu1 %162 }
  0x81   :  { %v165_v37 = vpop.permute.xlu1 %164 }
  0x86   :  { %v57_v12 = vpop.f32.mrf.mxu0 }
  0x87   :  { %v699_v16 = vadd.f32 %v558_v13, %v57_v12 }
  0x89   :  { %v63_v22 = vmul.f32 %v699_v16, %v661_v6  ;;  %v67_v25 = vmul.f32 %v699_v16, %v708_v18  ;;  %v65_v26 = vmul.f32 %v699_v16, %v666_v7  ;;  %v69_v28 = vmul.f32 %v699_v16, %v690_v11  ;;  %v175_v59 = vpop.permute.xlu1 %174 }
  0x8e   :  { %v60_v14 = vpop.f32.mrf.mxu0 }
  0x8f   :  { %v697_v15 = vadd.f32 %v558_v13, %v60_v14 }
  0x91   :  { %75 = vrot.lane.b32.xlu0 %v697_v15, %s618_s25  ;;  %v553_v17 = vpack.i.bf16 %v699_v16, %v697_v15  ;;  %v66_v23 = vmul.f32 %v697_v15, %v673_v8  ;;  %v64_v24 = vmul.f32 %v697_v15, %v678_v9  ;;  %v68_v27 = vmul.f32 %v697_v15, %v685_v10 }
  0x92   :  { %v70_v29 = vmul.f32 %v697_v15, %v714_v19 }
  0x99   :  { %73 = vrot.lane.b32.xlu0 %v699_v16, %s618_s25 }
  0xa1   :  { %170 = vrot.lane.b32.xlu0 %v708_v18, %s618_s25 }
  0xa9   :  { %176 = vrot.lane.b32.xlu0 %v714_v19, %s618_s25 }
 0x103   :  { %v76_v20 = vpop.permute.xlu0 %75 }
 0x104   :  { %524 = vmatpush.xpose.msk.msrb.mxu0 %vm33_vm0, %v76_v20  ;;  %544 = vmatpush.xpose.msk.msra.mxu1 %vm33_vm0, %v76_v20 }
 0x10b   :  { %v74_v21 = vpop.permute.xlu0 %73 }
 0x10c   :  { %525 = vmatpush.xpose.msk.msrb.mxu0 %vm33_vm0, %v74_v21  ;;  %545 = vmatpush.xpose.msk.msra.mxu1 %vm33_vm0, %v74_v21 }
 0x10f   :  { %526 = vmatmul.msk.f32.vlgmr.msrb.gmra.mxu0 %vm33_vm0, %v63_v22  ;;  %529 = vmatmul.msk.f32.vlgmr.msra.gmra.mxu1 %vm33_vm0, %v66_v23 }
 0x113   :  { %v171_v38 = vpop.permute.xlu0 %170 }
 0x117   :  { %527 = vmatmul.msk.f32.gmra.mxu0 %vm33_vm0, %v64_v24  ;;  %530 = vmatmul.msk.f32.gmra.mxu1 %vm33_vm0, %v67_v25 }
 0x11b   :  { %v177_v2 = vpop.permute.xlu0 %176 }
 0x11f   :  { %528 = vmatmul.msk.f32.gmra.mxu0 %vm33_vm0, %v65_v26  ;;  %531 = vmatmul.msk.f32.gmra.mxu1 %vm33_vm0, %v68_v27 }
 0x127   :  { %532 = vmatmul.msk.f32.gmra.mxu1 %vm33_vm0, %v69_v28 }
 0x12f   :  { %533 = vmatmul.msk.f32.gmra.mxu1 %vm33_vm0, %v70_v29 }
 0x18c   :  { %v122_v31 = vpop.f32.mrf.mxu0  ;;  %v131_v32 = vpop.f32.mrf.mxu1 }
 0x18d   :  { %v146_v33 = vmul.f32 0.35355338, %v122_v31  ;;  %v149_v45 = vmul.f32 0.35355338, %v131_v32 }
 0x18f   :  { %v186_v34 = vadd.f32 %v163_v30, %v146_v33  ;;  %v189_v51 = vadd.f32 %v169_v48, %v149_v45 }
 0x191   :  { %v195_v36 = vsel %vm194_vm1, %v186_v34, -inf  ;;  %v204_v55 = vsel %vm194_vm1, %v189_v51, -inf }
 0x192   :  { %196 = vmax.xlane.f32.xlu1 %v195_v36 }
 0x194   :  { %v125_v39 = vpop.f32.mrf.mxu0  ;;  %v134_v40 = vpop.f32.mrf.mxu1 }
 0x195   :  { %v147_v41 = vmul.f32 0.35355338, %v125_v39  ;;  %v150_v42 = vmul.f32 0.35355338, %v134_v40 }
 0x197   :  { %v187_v43 = vadd.f32 %v165_v37, %v147_v41  ;;  %v190_v44 = vadd.f32 %v171_v38, %v150_v42 }
 0x199   :  { %v207_v46 = vsel %vm194_vm1, %v190_v44, -inf  ;;  %v198_v47 = vsel %vm194_vm1, %v187_v43, -inf }
 0x19a   :  { %208 = vmax.xlane.f32.xlu1 %v207_v46  ;;  %199 = vmax.xlane.f32.xlu2 %v198_v47 }
 0x19c   :  { %v128_v49 = vpop.f32.mrf.mxu0  ;;  %v137_v50 = vpop.f32.mrf.mxu1 }
 0x19d   :  { %v148_v52 = vmul.f32 0.35355338, %v128_v49  ;;  %v151_v54 = vmul.f32 0.35355338, %v137_v50 }
 0x19f   :  { %v188_v53 = vadd.f32 %v167_v35, %v148_v52  ;;  %v191_v60 = vadd.f32 %v173_v57, %v151_v54 }
 0x1a1   :  { %v201_v56 = vsel %vm194_vm1, %v188_v53, -inf  ;;  %v210_v0 = vsel %vm194_vm1, %v191_v60, -inf }
 0x1a2   :  { %205 = vmax.xlane.f32.xlu2 %v204_v55  ;;  %202 = vmax.xlane.f32.xlu0 %v201_v56 }
 0x1a4   :  { %v140_v58 = vpop.f32.mrf.mxu1 }
 0x1a5   :  { %v152_v61 = vmul.f32 0.35355338, %v140_v58 }
 0x1a7   :  { %v192_v62 = vadd.f32 %v175_v59, %v152_v61 }
 0x1a9   :  { %v213_v63 = vsel %vm194_vm1, %v192_v62, -inf }
 0x1aa   :  { %214 = vmax.xlane.f32.xlu2 %v213_v63  ;;  %211 = vmax.xlane.f32.xlu0 %v210_v0 }
 0x1ac   :  { %v143_v1 = vpop.f32.mrf.mxu1 }
 0x1ad   :  { %v153_v3 = vmul.f32 0.35355338, %v143_v1 }
 0x1af   :  { %v193_v4 = vadd.f32 %v177_v2, %v153_v3 }
 0x1b1   :  { %v216_v5 = vsel %vm194_vm1, %v193_v4, -inf }
 0x1b2   :  { %217 = vmax.xlane.f32.xlu1 %v216_v5 }
 0x205   :  { %v197_v12 = vpop.xlane.xlu1 %196 }
 0x206   :  { %v219_v13 = vsub.f32 %v186_v34, %v197_v12 }
 0x208   :  { %v227_v14 = vmul.f32 1.442695, %v219_v13 }
 0x20a   :  { %560 = vpow2.f32 %v227_v14 }
 0x20d   :  { %v200_v20 = vpop.xlane.xlu2 %199  ;;  %v209_v27 = vpop.xlane.xlu1 %208 }
 0x20e   :  { %v220_v21 = vsub.f32 %v187_v43, %v200_v20  ;;  %v223_v33 = vsub.f32 %v190_v44, %v209_v27 }
 0x210   :  { %v753_v22 = vpop.eup %560  ;;  %v229_v23 = vmul.f32 1.442695, %v220_v21  ;;  %v235_v35 = vmul.f32 1.442695, %v223_v33 }
 0x211   :  { %v243_v24 = vsel %vm194_vm1, %v753_v22, 0.0 }
 0x212   :  { %244 = vadd.xlane.f32.xlu2 %v243_v24  ;;  %562 = vpow2.f32 %v229_v23 }
 0x215   :  { %v206_v25 = vpop.xlane.xlu2 %205  ;;  %v203_v26 = vpop.xlane.xlu0 %202 }
 0x216   :  { %v222_v28 = vsub.f32 %v189_v51, %v206_v25  ;;  %v221_v29 = vsub.f32 %v188_v53, %v203_v26 }
 0x218   :  { %v233_v30 = vmul.f32 1.442695, %v222_v28  ;;  %v231_v31 = vmul.f32 1.442695, %v221_v29  ;;  %v757_v32 = vpop.eup %562 }
 0x219   :  { %v246_v34 = vsel %vm194_vm1, %v757_v32, 0.0 }
 0x21a   :  { %564 = vpow2.f32 %v233_v30  ;;  %247 = vadd.xlane.f32.xlu0 %v246_v34 }
 0x21b   :  { %566 = vpow2.f32 %v231_v31 }
 0x21c   :  { %568 = vpow2.f32 %v235_v35 }
 0x21d   :  { %v215_v36 = vpop.xlane.xlu2 %214  ;;  %v212_v38 = vpop.xlane.xlu0 %211 }
 0x21e   :  { %v225_v37 = vsub.f32 %v192_v62, %v215_v36  ;;  %v224_v42 = vsub.f32 %v191_v60, %v212_v38 }
 0x220   :  { %v761_v39 = vpop.eup %564  ;;  %v239_v40 = vmul.f32 1.442695, %v225_v37  ;;  %v237_v45 = vmul.f32 1.442695, %v224_v42 }
 0x221   :  { %v763_v41 = vpop.eup %566  ;;  %v252_v43 = vsel %vm194_vm1, %v761_v39, 0.0 }
 0x222   :  { %570 = vpow2.f32 %v239_v40  ;;  %v249_v44 = vsel %vm194_vm1, %v763_v41, 0.0  ;;  %253 = vadd.xlane.f32.xlu0 %v252_v43  ;;  %v769_v48 = vpop.eup %568 }
 0x223   :  { %250 = vadd.xlane.f32.xlu1 %v249_v44  ;;  %572 = vpow2.f32 %v237_v45  ;;  %v255_v52 = vsel %vm194_vm1, %v769_v48, 0.0 }
 0x225   :  { %v218_v46 = vpop.xlane.xlu1 %217 }
 0x226   :  { %v226_v47 = vsub.f32 %v193_v4, %v218_v46 }
 0x228   :  { %v771_v49 = vpop.eup %570  ;;  %v241_v50 = vmul.f32 1.442695, %v226_v47 }
 0x229   :  { %v261_v51 = vsel %vm194_vm1, %v771_v49, 0.0  ;;  %v780_v53 = vpop.eup %572 }
 0x22a   :  { %574 = vpow2.f32 %v241_v50  ;;  %554 = vrot.lane.b32.xlu2 %v553_v17, %s619_s11  ;;  %262 = vadd.xlane.f32.xlu0 %v261_v51  ;;  %v258_v56 = vsel %vm194_vm1, %v780_v53, 0.0 }
 0x22b   :  { %256 = vadd.xlane.f32.xlu1 %v255_v52 }
 0x230   :  { %v782_v54 = vpop.eup %574 }
 0x231   :  { %v264_v55 = vsel %vm194_vm1, %v782_v54, 0.0 }
 0x232   :  { %265 = vadd.xlane.f32.xlu0 %v264_v55 }
 0x233   :  { %259 = vadd.xlane.f32.xlu1 %v258_v56 }
 0x285   :  { %v245_v57 = vpop.xlane.xlu2 %244 }
 0x286   :  { %576 = vrcp.f32 %v245_v57  ;;  %v278_v61 = vand.u32 2147483648, %v245_v57  ;;  %v276_v0 = vand.u32 2147483647, %v245_v57  ;;  %vm272_vm3 = vweird.f32 %v245_v57 }
 0x288   :  { %v279_v2 = vor.u32 1.1754944e-38, %v278_v61  ;;  %vm277_vm5 = vcmp.eq.f32.partialorder %v276_v0, 8.507059e+37 }
 0x28c   :  { %v577_v15 = vpop.eup %576 }
 0x28d   :  { %v268_v16 = vmul.f32 %v577_v15, %v245_v57  ;;  %v555_v17 = vpop.permute.xlu2 %554  ;;  %v248_v59 = vpop.xlane.xlu0 %247  ;;  %vm273_vm2 = vweird.f32 %v577_v15 }
 0x28e   :  { %v556_v58 = vunpack.i.l.bf16 %v555_v17  ;;  %578 = vrcp.f32 %v248_v59  ;;  %v557_v62 = vunpack.i.h.bf16 %v555_v17  ;;  %vm274_vm4 = vmor %vm272_vm3, %vm273_vm2  ;;  %v293_v24 = vand.u32 2147483648, %v248_v59 }
 0x28f   :  { %v269_v60 = vsub.f32 1.0, %v268_v16  ;;  %vm287_vm7 = vweird.f32 %v248_v59  ;;  %v291_v26 = vand.u32 2147483647, %v248_v59 }
 0x290   :  { %431 = vmatpush.msra.mxu2 %v556_v58  ;;  %546 = vmatpush.msra.mxu3 %v556_v58  ;;  %v294_v34 = vor.u32 1.1754944e-38, %v293_v24 }
 0x291   :  { %v270_v63 = vmul.f32 %v577_v15, %v269_v60  ;;  %vm292_vm9 = vcmp.eq.f32.partialorder %v291_v26, 8.507059e+37 }
 0x292   :  { %432 = vmatpush.msra.mxu2 %v557_v62  ;;  %547 = vmatpush.msra.mxu3 %v557_v62 }
 0x293   :  { %v271_v1 = vadd.f32 %v577_v15, %v270_v63 }
 0x294   :  { %v579_v3 = vpop.eup %578 }
 0x295   :  { %v275_v4 = vsel %vm274_vm4, %v577_v15, %v271_v1  ;;  %v283_v5 = vmul.f32 %v579_v3, %v248_v59  ;;  %v788_v13 = vpop.xlane.xlu0 %253  ;;  %vm288_vm6 = vweird.f32 %v579_v3 }
 0x296   :  { %v251_v12 = vpop.xlane.xlu1 %250  ;;  %v280_v14 = vsel %vm277_vm5, %v279_v2, %v275_v4  ;;  %vm289_vm8 = vmor %vm287_vm7, %vm288_vm6  ;;  %vm317_vm15 = vweird.f32 %v788_v13  ;;  %v323_v17 = vand.u32 2147483648, %v788_v13  ;;  %v321_v62 = vand.u32 2147483647, %v788_v13 }
 0x297   :  { %580 = vrcp.f32 %v251_v12  ;;  %v284_v20 = vsub.f32 1.0, %v283_v5  ;;  %v281_v21 = vmul.f32 %v753_v22, %v280_v14  ;;  %v308_v42 = vand.u32 2147483648, %v251_v12 }
 0x298   :  { %582 = vrcp.f32 %v788_v13  ;;  %v306_v44 = vand.u32 2147483647, %v251_v12  ;;  %vm302_vm11 = vweird.f32 %v251_v12  ;;  %v324_v5 = vor.u32 1.1754944e-38, %v323_v17 }
 0x299   :  { %v285_v23 = vmul.f32 %v579_v3, %v284_v20  ;;  %534 = vmatmul.msk.f32.vlgmr.msra.gmra.mxu2 %vm194_vm1, %v281_v21  ;;  %v309_v56 = vor.u32 1.1754944e-38, %v308_v42  ;;  %vm322_vm6 = vcmp.eq.f32.partialorder %v321_v62, 8.507059e+37 }
 0x29a   :  { %vm307_vm13 = vcmp.eq.f32.partialorder %v306_v44, 8.507059e+37 }
 0x29b   :  { %v286_v25 = vadd.f32 %v579_v3, %v285_v23 }
 0x29d   :  { %v581_v27 = vpop.eup %580  ;;  %v263_v31 = vpop.xlane.xlu0 %262  ;;  %v290_v33 = vsel %vm289_vm8, %v579_v3, %v286_v25 }
 0x29e   :  { %v793_v28 = vpop.eup %582  ;;  %v298_v29 = vmul.f32 %v581_v27, %v251_v12  ;;  %v795_v30 = vpop.xlane.xlu1 %256  ;;  %v295_v37 = vsel %vm292_vm9, %v294_v34, %v290_v33  ;;  %vm303_vm10 = vweird.f32 %v581_v27  ;;  %v368_v58 = vand.u32 2147483648, %v263_v31 }
 0x29f   :  { %v313_v22 = vmul.f32 %v793_v28, %v788_v13  ;;  %584 = vrcp.f32 %v795_v30  ;;  %v296_v40 = vmul.f32 %v757_v32, %v295_v37  ;;  %vm304_vm12 = vmor %vm302_vm11, %vm303_vm10  ;;  %vm318_vm14 = vweird.f32 %v793_v28 }
 0x2a0   :  { %v299_v35 = vsub.f32 1.0, %v298_v29  ;;  %586 = vrcp.f32 %v263_v31  ;;  %v366_v63 = vand.u32 2147483647, %v263_v31  ;;  %vm816_vm2 = vmor %vm317_vm15, %vm318_vm14  ;;  %vm362_vm4 = vweird.f32 %v263_v31 }
 0x2a1   :  { %v314_v36 = vsub.f32 1.0, %v313_v22  ;;  %535 = vmatmul.msk.f32.gmra.mxu2 %vm194_vm1, %v296_v40  ;;  %v369_v12 = vor.u32 1.1754944e-38, %v368_v58  ;;  %vm332_vm9 = vweird.f32 %v795_v30 }
 0x2a2   :  { %v300_v38 = vmul.f32 %v581_v27, %v299_v35  ;;  %vm367_vm7 = vcmp.eq.f32.partialorder %v366_v63, 8.507059e+37 }
 0x2a3   :  { %v315_v46 = vmul.f32 %v793_v28, %v314_v36 }
 0x2a4   :  { %v301_v43 = vadd.f32 %v581_v27, %v300_v38 }
 0x2a5   :  { %v802_v45 = vpop.eup %584  ;;  %v266_v52 = vpop.xlane.xlu0 %265  ;;  %v316_v16 = vadd.f32 %v793_v28, %v315_v46 }
 0x2a6   :  { %v587_v47 = vpop.eup %586  ;;  %v328_v50 = vmul.f32 %v802_v45, %v795_v30  ;;  %v807_v51 = vpop.xlane.xlu1 %259  ;;  %v305_v55 = vsel %vm304_vm12, %v581_v27, %v301_v43  ;;  %vm333_vm8 = vweird.f32 %v802_v45  ;;  %v383_v29 = vand.u32 2147483648, %v266_v52 }
 0x2a7   :  { %v358_v32 = vmul.f32 %v587_v47, %v263_v31  ;;  %588 = vrcp.f32 %v807_v51  ;;  %v310_v59 = vsel %vm307_vm13, %v309_v56, %v305_v55  ;;  %vm363_vm3 = vweird.f32 %v587_v47  ;;  %vm334_vm11 = vmor %vm332_vm9, %vm333_vm8  ;;  %v18_v55 = vld [vmem:[%s876_s1 + $0x30] sm:$0xff] }
 0x2a8   :  { %590 = vrcp.f32 %v266_v52  ;;  %v329_v57 = vsub.f32 1.0, %v328_v50  ;;  %v311_v61 = vmul.f32 %v763_v41, %v310_v59  ;;  %v320_v3 = vsel %vm816_vm2, %v793_v28, %v316_v16  ;;  %vm364_vm5 = vmor %vm362_vm4, %vm363_vm3 }
 0x2a9   :  { %v359_v15 = vsub.f32 1.0, %v358_v32  ;;  %v325_v21 = vsel %vm322_vm6, %v324_v5, %v320_v3  ;;  %v338_v28 = vand.u32 2147483648, %v795_v30  ;;  %v336_v31 = vand.u32 2147483647, %v795_v30 }
 0x2aa   :  { %v330_v2 = vmul.f32 %v802_v45, %v329_v57  ;;  %536 = vmatmul.msk.f32.gmra.mxu2 %vm194_vm1, %v311_v61  ;;  %v381_v34 = vand.u32 2147483647, %v266_v52  ;;  %v326_v22 = vmul.f32 %v761_v39, %v325_v21  ;;  %vm377_vm12 = vweird.f32 %v266_v52 }
 0x2ab   :  { %v360_v60 = vmul.f32 %v587_v47, %v359_v15  ;;  %v339_v37 = vor.u32 1.1754944e-38, %v338_v28  ;;  %v384_v38 = vor.u32 1.1754944e-38, %v383_v29  ;;  %vm337_vm15 = vcmp.eq.f32.partialorder %v336_v31, 8.507059e+37 }
 0x2ac   :  { %v331_v27 = vadd.f32 %v802_v45, %v330_v2  ;;  %vm382_vm14 = vcmp.eq.f32.partialorder %v381_v34, 8.507059e+37  ;;  %v353_v44 = vand.u32 2147483648, %v807_v51  ;;  %vm347_vm3 = vweird.f32 %v807_v51 }
 0x2ad   :  { %v589_v1 = vpop.eup %588  ;;  %v361_v4 = vadd.f32 %v587_v47, %v360_v60  ;;  %v351_v46 = vand.u32 2147483647, %v807_v51 }
 0x2ae   :  { %v591_v41 = vpop.eup %590  ;;  %v343_v13 = vmul.f32 %v589_v1, %v807_v51  ;;  %vm348_vm2 = vweird.f32 %v589_v1  ;;  %v354_v50 = vor.u32 1.1754944e-38, %v353_v44 }
 0x2af   :  { %v373_v14 = vmul.f32 %v591_v41, %v266_v52  ;;  %v365_v20 = vsel %vm364_vm5, %v587_v47, %v361_v4  ;;  %vm378_vm10 = vweird.f32 %v591_v41  ;;  %vm349_vm4 = vmor %vm347_vm3, %vm348_vm2  ;;  %vm352_vm5 = vcmp.eq.f32.partialorder %v351_v46, 8.507059e+37 }
 0x2b0   :  { %v370_v23 = vsel %vm367_vm7, %v369_v12, %v365_v20  ;;  %v344_v24 = vsub.f32 1.0, %v343_v13  ;;  %vm379_vm13 = vmor %vm377_vm12, %vm378_vm10 }
 0x2b1   :  { %v374_v25 = vsub.f32 1.0, %v373_v14  ;;  %v371_v26 = vmul.f32 %v771_v49, %v370_v23  ;;  %v335_v49 = vsel %vm334_vm11, %v802_v45, %v331_v27 }
 0x2b2   :  { %v345_v35 = vmul.f32 %v589_v1, %v344_v24  ;;  %537 = vmatmul.msk.f32.gmra.mxu2 %vm194_vm1, %v326_v22  ;;  %v340_v40 = vsel %vm337_vm15, %v339_v37, %v335_v49 }
 0x2b3   :  { %v375_v33 = vmul.f32 %v591_v41, %v374_v25  ;;  %540 = vmatmul.msk.f32.vlgmr.msra.gmra.mxu3 %vm194_vm1, %v371_v26  ;;  %v341_v45 = vmul.f32 %v769_v48, %v340_v40  ;;  %v19_v48 = vld [vmem:[%s876_s1 + $0x38] sm:$0xff] }
 0x2b4   :  { %v346_v43 = vadd.f32 %v589_v1, %v345_v35 }
 0x2b5   :  { %v376_v36 = vadd.f32 %v591_v41, %v375_v33 }
 0x2b6   :  { %v350_v47 = vsel %vm349_vm4, %v589_v1, %v346_v43 }
 0x2b7   :  { %v380_v30 = vsel %vm379_vm13, %v591_v41, %v376_v36  ;;  %v355_v52 = vsel %vm352_vm5, %v354_v50, %v350_v47 }
 0x2b8   :  { %v385_v42 = vsel %vm382_vm14, %v384_v38, %v380_v30  ;;  %v356_v32 = vmul.f32 %v780_v53, %v355_v52  ;;  %v17_v53 = vld [vmem:[%s876_s1 + $0x28] sm:$0xff] }
 0x2b9   :  { %v386_v39 = vmul.f32 %v782_v54, %v385_v42  ;;  %v20_v54 = vld [vmem:[%s876_s1 + $0x40] sm:$0xff] }
 0x2ba   :  { %538 = vmatmul.msk.f32.gmra.mxu2 %vm194_vm1, %v341_v45  ;;  %491 = vmatpush.msrb.mxu3 %v20_v54 }
 0x2bb   :  { %541 = vmatmul.msk.f32.gmra.mxu3 %vm194_vm1, %v386_v39 }
 0x2bc   :  { %492 = vmatpush.msrb.mxu3 %v19_v48 }
 0x2be   :  { %493 = vmatpush.msrb.mxu3 %v18_v55 }
 0x2c0   :  { %494 = vmatpush.msrb.mxu3 %v17_v53 }
 0x2c2   :  { %539 = vmatmul.msk.f32.gmra.mxu2 %vm194_vm1, %v356_v32 }
 0x31c   :  { %v434_v51 = vpop.f32.mrf.mxu2 }
 0x31d   :  { %v458_v58 = vmul.f32 %v434_v51, %v661_v6 }
 0x324   :  { %v437_v56 = vpop.f32.mrf.mxu2 }
 0x325   :  { %v459_v2 = vmul.f32 %v437_v56, %v678_v9 }
 0x32d   :  { %v440_v57 = vpop.f32.mrf.mxu2 }
 0x32e   :  { %v460_v16 = vmul.f32 %v440_v57, %v666_v7 }
 0x330   :  { %v466_v60 = vadd.f32 %v460_v16, %v458_v58 }
 0x335   :  { %v443_v15 = vpop.f32.mrf.mxu2 }
 0x336   :  { %v452_v17 = vpop.f32.mrf.mxu3  ;;  %v461_v0 = vmul.f32 %v443_v15, %v673_v8  ;;  %v559_v8 = vld [vmem:[%s876_s1 + $0x48] ss:$0 sm:$0xff] }
 0x337   :  { %v464_v62 = vmul.f32 %v452_v17, %v690_v11 }
 0x338   :  { %v467_v7 = vadd.f32 %v461_v0, %v459_v2 }
 0x33d   :  { %v446_v59 = vpop.f32.mrf.mxu2 }
 0x33e   :  { %v462_v61 = vmul.f32 %v446_v59, %v708_v18  ;;  %v455_v3 = vpop.f32.mrf.mxu3 }
 0x33f   :  { %v465_v6 = vmul.f32 %v455_v3, %v714_v19 }
 0x340   :  { %v468_v63 = vadd.f32 %v466_v60, %v462_v61 }
 0x342   :  { %v470_v1 = vadd.f32 %v468_v63, %v464_v62 }
 0x344   :  { %542 = vmatmul.msk.f32.vlgmr.msrb.gmra.mxu3 %vm33_vm0, %v470_v1 }
 0x345   :  { %v449_v4 = vpop.f32.mrf.mxu2 }
 0x346   :  { %v463_v41 = vmul.f32 %v449_v4, %v685_v10 }
 0x348   :  { %v469_v5 = vadd.f32 %v467_v7, %v463_v41 }
 0x34a   :  { %v471_v12 = vadd.f32 %v469_v5, %v465_v6 }
 0x34c   :  { %543 = vmatmul.msk.f32.gmra.mxu3 %vm33_vm0, %v471_v12 }
 0x3c7   :  { %v496_v11 = vpop.f32.mrf.mxu3 }
 0x3c8   :  { %v497_v18 = vadd.f32 %v559_v8, %v496_v11 }
 0x3ca   :  { %502 = vst.msk [vmem:[#allocation2] sm:$0xff] %vm33_vm0, %v497_v18 }
 0x3cf   :  { %v499_v9 = vpop.f32.mrf.mxu3 }
 0x3d0   :  { %v500_v10 = vadd.f32 %v559_v8, %v499_v9 }
 0x3d2   :  { %503 = vst.msk [vmem:[#allocation2 + $0x8] sm:$0xff] %vm33_vm0, %v500_v10 }
 0x3d3   :  { %516 = dma.vmem_to_hbm [thread:$0]  %s509_s23, 256, %s511_s26, [#allocation3], %s621_s27, %s621_s27, %s622_s0  }
 0x3d4   :  { %616 = dma.done.wait [#allocation3], 256  }
 0x3d5   :  { %617 = vsyncadd [#allocation3], 4294967040 }
 0x3d6   :  { %521 = vsyncpa [#allocation3], 1 }

</bundles_post_ra>
